<compile_context>
chip_gen: v6e
topology: v6e:2x2x1
jax: 0.10.0
libtpu: 0.0.40
codegen_flags: <defaults>
</compile_context>

<pallas_src>
import math

import jax
import jax.numpy as jnp
from jax.experimental import pallas as pl
from jax.experimental.pallas import tpu as pltpu

_NEG_SLOPE = 0.2


def _linear_block_kernel(x_ref, w1_ref, b1_ref, w2_ref, b2_ref, o_ref):
    # Linear 1 (MXU, f32 accumulation) + LeakyReLU(0.2).
    h = jnp.dot(x_ref[...].astype(w1_ref.dtype), w1_ref[...],
                preferred_element_type=jnp.float32)
    h = h + b1_ref[...].astype(jnp.float32)
    h = jnp.maximum(h, _NEG_SLOPE * h)          # mul+max: 2 VALU ops/elem
    # Linear 2 + LeakyReLU(0.2).
    y = jnp.dot(h.astype(w2_ref.dtype), w2_ref[...],
                preferred_element_type=jnp.float32)
    y = y + b2_ref[...].astype(jnp.float32)
    y = jnp.maximum(y, _NEG_SLOPE * y)
    o_ref[...] = y.astype(o_ref.dtype)


def _vmem_budget_bytes():
    """~75% of physical VMEM (leaves headroom for compiler scratch)."""
    try:
        cap = int(pltpu.get_tpu_info().vmem_capacity_bytes)
    except Exception:
        cap = 64 << 20          # conservative fallback: v7x per-TC VMEM
    return (cap * 3) // 4


def linear_block(x, w1, b1, w2, b2, *, tile_m=2048, matmul_in_bf16=False):
    """Pallas implementation of LinearBlock.forward.

    x  : (..., in_dim)
    w1 : (in_dim, out_dim)    b1 : (out_dim,)
    w2 : (out_dim, out_dim)   b2 : (out_dim,)
    """
    in_dim, out_dim = w1.shape
    assert x.shape[-1] == in_dim
    assert w2.shape == (out_dim, out_dim)
    assert b1.shape == (out_dim,) and b2.shape == (out_dim,)

    orig_shape = x.shape
    m = 1
    for s in orig_shape[:-1]:
        m *= int(s)

    if m == 0:                                   # empty leading dims
        return jnp.zeros((*orig_shape[:-1], out_dim), dtype=x.dtype)

    x2 = x.reshape(m, in_dim)                    # contiguous reshape: free
    b1_2d = b1.reshape(1, out_dim)
    b2_2d = b2.reshape(1, out_dim)

    if matmul_in_bf16:
        # bf16 MXU operands; accumulation / bias / activation stay f32.
        w1 = w1.astype(jnp.bfloat16)
        w2 = w2.astype(jnp.bfloat16)

    isz = x.dtype.itemsize
    wsz = jnp.dtype(w1.dtype).itemsize
    osz = isz

    # --- VMEM budget -> row tile size (generation-aware) ------------------
    weight_bytes = (in_dim * out_dim + out_dim * out_dim) * wsz \
        + 2 * out_dim * b1.dtype.itemsize            # single-buffered residents
    per_row_bytes = (2 * in_dim * isz                # x tile, double-buffered
                     + 2 * out_dim * osz             # out tile, double-buffered
                     + 2 * out_dim * 4)              # f32 intermediates h / y
    budget = _vmem_budget_bytes()
    avail = budget - weight_bytes - (4 << 20)        # margin for compiler scratch
    if avail <= per_row_bytes:
        # TODO(synk): K/N-tiled fallback (extra grid axis over out_dim columns
        # with an f32 VMEM accumulator) for layers whose weights alone do not
        # fit in VMEM.
        raise NotImplementedError(
            f"out_dim={out_dim} too large for fully-resident weights on this "
            f"chip (VMEM budget {budget >> 20} MiB).")

    # Dtype-aware sublane granularity: f32 -> 8, bf16/f16 -> 16, int8/fp8 -> 32.
    sub = {4: 8, 2: 16, 1: 32}.get(isz, 8)
    max_tm = max(sub, ((avail // per_row_bytes) // sub) * sub)
    cand = min(int(tile_m), max_tm)
    if m <= cand:
        tm = m                                   # full-extent row block
    else:
        tm = max(sub, (cand // sub) * sub)

    grid = (pl.cdiv(m, tm),)                     # ragged trailing block is masked

    vmem_limit = int(min(budget, weight_bytes + tm * per_row_bytes + (8 << 20)))

    cost = pl.CostEstimate(
        flops=2 * m * out_dim * (in_dim + out_dim) + 4 * m * out_dim,
        transcendentals=0,
        bytes_accessed=m * in_dim * isz + m * out_dim * osz + weight_bytes,
    )

    out_2d = pl.pallas_call(
        _linear_block_kernel,
        out_shape=jax.ShapeDtypeStruct((m, out_dim), x.dtype),
        grid_spec=pltpu.PrefetchScalarGridSpec(
            num_scalar_prefetch=0,
            grid=grid,
            in_specs=[
                # Streaming row tile of x (double-buffered by default).
                pl.BlockSpec((tm, in_dim), lambda i: (i, 0)),
                # Constant-index residents: single-buffer to halve their VMEM.
                pl.BlockSpec((in_dim, out_dim), lambda i: (0, 0),
                             pipeline_mode=pl.Buffered(1)),
                pl.BlockSpec((1, out_dim), lambda i: (0, 0),
                             pipeline_mode=pl.Buffered(1)),
                pl.BlockSpec((out_dim, out_dim), lambda i: (0, 0),
                             pipeline_mode=pl.Buffered(1)),
                pl.BlockSpec((1, out_dim), lambda i: (0, 0),
                             pipeline_mode=pl.Buffered(1)),
            ],
            out_specs=pl.BlockSpec((tm, out_dim), lambda i: (i, 0)),
        ),
        compiler_params=pltpu.CompilerParams(
            # Row tiles are independent.
            # TODO(synk): on v7x, verify 2-TC sharding; switch this axis to
            # pltpu.CORE_PARALLEL if a single 'parallel' axis is not split.
            dimension_semantics=("parallel",),
            vmem_limit_bytes=vmem_limit,
        ),
        cost_estimate=cost,
    )(x2, w1, b1_2d, w2, b2_2d)

    return out_2d.reshape(*orig_shape[:-1], out_dim)


if __name__ == "__main__":
    key = jax.random.PRNGKey(0)
    kx, kw1, kb1, kw2, kb2 = jax.random.split(key, 5)

    # Small shapes consistent with the module: x is (..., in_dim).
    lead = (2, 8)
    in_dim, out_dim = 32, 32

    x = jax.random.normal(kx, (*lead, in_dim), dtype=jnp.float32)

    # Parameters mimicking kaiming_leaky_init (a=0.2, fan_in) + default
    # PyTorch Linear bias init; exact values are just deterministic test data.
    gain = math.sqrt(2.0 / (1.0 + 0.2 ** 2))
    w1 = jax.random.normal(kw1, (in_dim, out_dim), jnp.float32) * (gain / math.sqrt(in_dim))
    b1 = jax.random.uniform(kb1, (out_dim,), jnp.float32, -1.0, 1.0) / math.sqrt(in_dim)
    w2 = jax.random.normal(kw2, (out_dim, out_dim), jnp.float32) * (gain / math.sqrt(out_dim))
    b2 = jax.random.uniform(kb2, (out_dim,), jnp.float32, -1.0, 1.0) / math.sqrt(out_dim)

    out = linear_block(x, w1, b1, w2, b2)
    jax.block_until_ready(out)

    def _leaky(v):
        return jnp.where(v > 0, v, 0.2 * v)

    ref = _leaky(_leaky(x @ w1 + b1) @ w2 + b2)

    assert out.shape == ref.shape
    assert jnp.allclose(out, ref, atol=1e-5, rtol=1e-5)
    print("KERNEL_OK")
</pallas_src>

<mosaic_0001>
module attributes {stable_mosaic.version = 11 : i64} {
  func.func @_linear_block_kernel(%arg0: i32, %arg1: memref<16x32xf32, #tpu.memory_space<vmem>>, %arg2: memref<32x32xf32, #tpu.memory_space<vmem>>, %arg3: memref<1x32xf32, #tpu.memory_space<vmem>>, %arg4: memref<32x32xf32, #tpu.memory_space<vmem>>, %arg5: memref<1x32xf32, #tpu.memory_space<vmem>>, %arg6: memref<16x32xf32, #tpu.memory_space<vmem>>) attributes {dimension_semantics = [#tpu.dimension_semantics<parallel>], iteration_bounds = array<i64: 1>, scalar_prefetch = 0 : i64, scratch_operands = 0 : i64, tpu.core_type = #tpu.core_type<tc>, window_params = [{transform_indices = @transform_0, window_bounds = array<i64: 16, 32>}, {pipeline_mode = #tpu.pipeline_mode<synchronous>, transform_indices = @transform_1, window_bounds = array<i64: 32, 32>}, {pipeline_mode = #tpu.pipeline_mode<synchronous>, transform_indices = @transform_2, window_bounds = array<i64: 1, 32>}, {pipeline_mode = #tpu.pipeline_mode<synchronous>, transform_indices = @transform_3, window_bounds = array<i64: 32, 32>}, {pipeline_mode = #tpu.pipeline_mode<synchronous>, transform_indices = @transform_4, window_bounds = array<i64: 1, 32>}, {transform_indices = @transform_5, window_bounds = array<i64: 16, 32>}]} {
    %c0 = arith.constant 0 : index
    %c0_0 = arith.constant 0 : index
    %0 = vector.load %arg1[%c0, %c0_0] : memref<16x32xf32, #tpu.memory_space<vmem>>, vector<16x32xf32>
    %c0_1 = arith.constant 0 : index
    %c0_2 = arith.constant 0 : index
    %1 = vector.load %arg2[%c0_1, %c0_2] : memref<32x32xf32, #tpu.memory_space<vmem>>, vector<32x32xf32>
    %cst = arith.constant dense<0.000000e+00> : vector<16x32xf32>
    %2 = tpu.matmul %0, %1, %cst {dimension_numbers = #tpu.dot_dimension_numbers<[1], [0], [0], [1], [0, 0, 1, 1], [], []>} : vector<16x32xf32>, vector<32x32xf32>, vector<16x32xf32> -> vector<16x32xf32>
    %c0_3 = arith.constant 0 : index
    %c0_4 = arith.constant 0 : index
    %3 = vector.load %arg3[%c0_3, %c0_4] : memref<1x32xf32, #tpu.memory_space<vmem>>, vector<1x32xf32>
    %4 = vector.broadcast %3 : vector<1x32xf32> to vector<16x32xf32>
    %5 = arith.addf %2, %4 : vector<16x32xf32>
    %cst_5 = arith.constant 2.000000e-01 : f32
    %6 = vector.broadcast %cst_5 : f32 to vector<16x32xf32>
    %7 = arith.mulf %6, %5 : vector<16x32xf32>
    %8 = arith.maximumf %5, %7 : vector<16x32xf32>
    %c0_6 = arith.constant 0 : index
    %c0_7 = arith.constant 0 : index
    %9 = vector.load %arg4[%c0_6, %c0_7] : memref<32x32xf32, #tpu.memory_space<vmem>>, vector<32x32xf32>
    %cst_8 = arith.constant dense<0.000000e+00> : vector<16x32xf32>
    %10 = tpu.matmul %8, %9, %cst_8 {dimension_numbers = #tpu.dot_dimension_numbers<[1], [0], [0], [1], [0, 0, 1, 1], [], []>} : vector<16x32xf32>, vector<32x32xf32>, vector<16x32xf32> -> vector<16x32xf32>
    %c0_9 = arith.constant 0 : index
    %c0_10 = arith.constant 0 : index
    %11 = vector.load %arg5[%c0_9, %c0_10] : memref<1x32xf32, #tpu.memory_space<vmem>>, vector<1x32xf32>
    %12 = vector.broadcast %11 : vector<1x32xf32> to vector<16x32xf32>
    %13 = arith.addf %10, %12 : vector<16x32xf32>
    %cst_11 = arith.constant 2.000000e-01 : f32
    %14 = vector.broadcast %cst_11 : f32 to vector<16x32xf32>
    %15 = arith.mulf %14, %13 : vector<16x32xf32>
    %16 = arith.maximumf %13, %15 : vector<16x32xf32>
    %c0_12 = arith.constant 0 : index
    %c0_13 = arith.constant 0 : index
    %17 = vector.load %arg6[%c0_12, %c0_13] : memref<16x32xf32, #tpu.memory_space<vmem>>, vector<16x32xf32>
    tpu.vector_store %arg6[%c0_12, %c0_13], %16 {strides = array<i32>} : memref<16x32xf32, #tpu.memory_space<vmem>>, vector<16x32xf32>,
    return
  }
  func.func @transform_0(%arg0: i32) -> (i32, i32) {
    %c0_i32 = arith.constant 0 : i32
    %c0_i32_0 = arith.constant 0 : i32
    return %arg0, %c0_i32 : i32, i32
  }
  func.func @transform_1(%arg0: i32) -> (i32, i32) {
    %c0_i32 = arith.constant 0 : i32
    %c0_i32_0 = arith.constant 0 : i32
    %c0_i32_1 = arith.constant 0 : i32
    return %c0_i32, %c0_i32_0 : i32, i32
  }
  func.func @transform_2(%arg0: i32) -> (i32, i32) {
    %c0_i32 = arith.constant 0 : i32
    %c0_i32_0 = arith.constant 0 : i32
    %c0_i32_1 = arith.constant 0 : i32
    return %c0_i32, %c0_i32_0 : i32, i32
  }
  func.func @transform_3(%arg0: i32) -> (i32, i32) {
    %c0_i32 = arith.constant 0 : i32
    %c0_i32_0 = arith.constant 0 : i32
    %c0_i32_1 = arith.constant 0 : i32
    return %c0_i32, %c0_i32_0 : i32, i32
  }
  func.func @transform_4(%arg0: i32) -> (i32, i32) {
    %c0_i32 = arith.constant 0 : i32
    %c0_i32_0 = arith.constant 0 : i32
    %c0_i32_1 = arith.constant 0 : i32
    return %c0_i32, %c0_i32_0 : i32, i32
  }
  func.func @transform_5(%arg0: i32) -> (i32, i32) {
    %c0_i32 = arith.constant 0 : i32
    %c0_i32_0 = arith.constant 0 : i32
    return %arg0, %c0_i32 : i32, i32
  }
}

</mosaic_0001>

<bundles_post_ra>
// kernel: tpu_custom_call.1
= control target key start
LH: loop header
LB: loop body
LE: loop exit
PB: predicated region body
PF: predicated region fallthrough
CT: control target
= control target key end

     0   :  { %10 = vsyncpa [#allocation3], 0  ;;  %s481_s0 = inlined_call_operand.hbm [shape: f32[16,32], index: 0, kind: input, shape index: {}]   ;;  %s482_s1 = inlined_call_operand.hbm [shape: f32[32,32], index: 1, kind: input, shape index: {}]   ;;  %s483_s2 = inlined_call_operand.vmem [shape: f32[1,32], index: 2, kind: input, shape index: {}]   ;;  %s484_s3 = inlined_call_operand.hbm [shape: f32[32,32], index: 3, kind: input, shape index: {}]   ;;  %s485_s4 = inlined_call_operand.vmem [shape: f32[1,32], index: 4, kind: input, shape index: {}]   ;;  %s486_s5 = inlined_call_operand.hbm [shape: f32[16,32], index: 5, kind: output, shape index: {}]  }
   0x1   :  { %11 = vsyncpa [#allocation6], 0 }
   0x2   :  { %12 = vsyncpa [#allocation4], 0  ;;  %s409_s18 = smov [#allocation5]   ;;  %s410_s20 = smov [#allocation2]  }
   0x3   :  { %s30_s19 = sshll.u32 %s409_s18, 4  ;;  %s18_s21 = sshll.u32 %s410_s20, 4  ;;  %s31_s19 = int_to_ptr.vmem [resolvable:$true] %s30_s19  ;;  %s19_s21 = int_to_ptr.vmem [resolvable:$true] %s18_s21 }
   0x4   :  { %s331_s22 = scalar_lea.vmem %s31_s19, 512  ;;  %p336_p1 = scmp.lt.s32.totalorder %s31_s19, %s31_s19 }
   0x5   :  { %p332_p0 = scmp.ne.s32.totalorder %s31_s19, %s331_s22  ;;  %p337_p2 = scmp.lt.s32.totalorder %s331_s22, %s331_s22 }
   0x7   :  { %p338_p3 = por %p337_p2, %p336_p1 }
   0x9   :  { %p339_p4 = pnand %p338_p3, %p332_p0 }
   0xb   :  { %342 = shalt.err (!%p339_p4)
}
   0xc   :  { %s411_s23 = smov 128   ;;  %s412_s24 = smov 8  }
   0xd   :  { %36 = dma.hbm_to_vmem [thread:$0]  %s482_s1, 512, %s31_s19, [#allocation6], %s411_s23, %s411_s23, %s412_s24  }
   0xe   :  { %s351_s27 = scalar_lea.vmem %s19_s21, 256  ;;  %p356_p6 = scmp.lt.s32.totalorder %s19_s21, %s19_s21 }
   0xf   :  { %p352_p5 = scmp.ne.s32.totalorder %s19_s21, %s351_s27  ;;  %p357_p7 = scmp.lt.s32.totalorder %s351_s27, %s351_s27 }
  0x11   :  { %p358_p8 = por %p357_p7, %p356_p6 }
  0x13   :  { %p359_p9 = pnand %p358_p8, %p352_p5 }
  0x15   :  { %362 = shalt.err (!%p359_p9)
}
  0x16   :  { %24 = dma.hbm_to_vmem [thread:$0]  %s481_s0, 256, %s19_s21, [#allocation3], %s411_s23, %s411_s23, %s412_s24  }
  0x17   :  { %s413_s30 = smov [#allocation7]  }
  0x18   :  { %s44_s6 = sshll.u32 %s413_s30, 4  ;;  %s45_s6 = int_to_ptr.vmem [resolvable:$true] %s44_s6 }
  0x19   :  { %s371_s7 = scalar_lea.vmem %s45_s6, 512  ;;  %p376_p11 = scmp.lt.s32.totalorder %s45_s6, %s45_s6 }
  0x1a   :  { %p372_p10 = scmp.ne.s32.totalorder %s45_s6, %s371_s7  ;;  %p377_p12 = scmp.lt.s32.totalorder %s371_s7, %s371_s7 }
  0x1c   :  { %p378_p13 = por %p377_p12, %p376_p11 }
  0x1e   :  { %p379_p0 = pnand %p378_p13, %p372_p10 }
  0x20   :  { %382 = shalt.err (!%p379_p0)
}
  0x21   :  { %50 = dma.hbm_to_vmem [thread:$0]  %s484_s3, 512, %s45_s6, [#allocation6], %s411_s23, %s411_s23, %s412_s24  }
  0x22   :  { %403 = dma.done.wait [#allocation3], 256  }
  0x23   :  { %404 = vsyncadd [#allocation3], 4294967040 }
  0x24   :  { %405 = dma.done.wait [#allocation6], 1024  }
  0x25   :  { %406 = vsyncadd [#allocation6], 4294966272  ;;  %vm75_vm0 = vcmask 261120   ;;  %v67_v0 = vld [vmem:[#allocation5 + $0x18] sm:$0xff]  ;;  %v66_v1 = vld [vmem:[#allocation5 + $0x10] sm:$0xff] }
  0x26   :  { %295 = vmatprep.subr.mxu0 %v67_v0  ;;  %v62_v2 = vld [vmem:[#allocation2] sm:$0xff]  ;;  %v65_v3 = vld [vmem:[#allocation5 + $0x8] sm:$0xff]  ;;  %v64_v4 = vld [vmem:[#allocation5] sm:$0xff] }
  0x27   :  { %296 = vmatpush3.msra.mxu0 %v67_v0  ;;  %303 = vmatprep.mubr.msk.f32.mxu0 %vm75_vm0, %v62_v2  ;;  %v63_v5 = vld [vmem:[#allocation2 + $0x8] sm:$0xff]  ;;  %v163_v7 = vld [vmem:[#allocation7 + $0x10] sm:$0xff]  ;;  %v162_v8 = vld [vmem:[#allocation7 + $0x8] sm:$0xff] }
  0x28   :  { %297 = vmatprep.subr.mxu0 %v66_v1  ;;  %v164_v6 = vld [vmem:[#allocation7 + $0x18] sm:$0xff]  ;;  %v161_v9 = vld [vmem:[#allocation7] sm:$0xff]  ;;  %v277_v10 = vld [vmem:[%s483_s2] ss:$0 sm:$0xff]  ;;  %s414_s2 = smov [#allocation8]  }
  0x29   :  { %298 = vmatpush3.msra.mxu0 %v66_v1  ;;  %306 = vmatprep.subr.mxu1 %v164_v6  ;;  %v280_v19 = vld [vmem:[%s485_s4] ss:$0 sm:$0xff]  ;;  %s264_s11 = sshll.u32 %s414_s2, 4  ;;  %s265_s11 = int_to_ptr.vmem [resolvable:$true] %s264_s11 }
  0x2a   :  { %299 = vmatprep.subr.mxu0 %v65_v3  ;;  %307 = vmatpush3.msra.mxu1 %v164_v6  ;;  %s383_s12 = scalar_lea.vmem %s265_s11, 256  ;;  %p388_p2 = scmp.lt.s32.totalorder %s265_s11, %s265_s11 }
  0x2b   :  { %300 = vmatpush3.msra.mxu0 %v65_v3  ;;  %308 = vmatprep.subr.mxu1 %v163_v7  ;;  %p384_p1 = scmp.ne.s32.totalorder %s265_s11, %s383_s12  ;;  %p389_p3 = scmp.lt.s32.totalorder %s383_s12, %s383_s12 }
  0x2c   :  { %301 = vmatprep.subr.mxu0 %v64_v4  ;;  %309 = vmatpush3.msra.mxu1 %v163_v7 }
  0x2d   :  { %302 = vmatpush3.msra.mxu0 %v64_v4  ;;  %310 = vmatprep.subr.mxu1 %v162_v8  ;;  %p390_p4 = por %p389_p3, %p388_p2 }
  0x2e   :  { %304 = vmatmul.mubr.msk.f32.vlgmr.msra.gmra.mxu0 %vm75_vm0, %v63_v5  ;;  %311 = vmatpush3.msra.mxu1 %v162_v8 }
  0x2f   :  { %312 = vmatprep.subr.mxu1 %v161_v9  ;;  %p391_p5 = pnand %p390_p4, %p384_p1 }
  0x30   :  { %313 = vmatpush3.msra.mxu1 %v161_v9 }
  0xee   :  { %v305_v11 = vpop.f32.mrf.mxu0 }
  0xef   :  { %v154_v12 = vadd.f32 %v305_v11, %v277_v10 }
  0xf0   :  { %v148_v13 = vpop.f32.mrf.mxu0 }
  0xf1   :  { %v149_v14 = vadd.f32 %v277_v10, %v148_v13  ;;  %v158_v15 = vmul.f32 0.2, %v154_v12 }
  0xf3   :  { %v157_v16 = vmul.f32 0.2, %v149_v14  ;;  %v160_v18 = vmax.f32 %v154_v12, %v158_v15 }
  0xf5   :  { %v159_v17 = vmax.f32 %v149_v14, %v157_v16 }
  0xf7   :  { %314 = vmatprep.mubr.msk.f32.mxu1 %vm75_vm0, %v159_v17 }
  0xf8   :  { %315 = vmatmul.mubr.msk.f32.vlgmr.msra.gmra.mxu1 %vm75_vm0, %v160_v18 }
 0x1b8   :  { %v316_v20 = vpop.f32.mrf.mxu1 }
 0x1b9   :  { %v250_v21 = vadd.f32 %v316_v20, %v280_v19 }
 0x1ba   :  { %v244_v22 = vpop.f32.mrf.mxu1 }
 0x1bb   :  { %v254_v23 = vmul.f32 0.2, %v250_v21  ;;  %v245_v24 = vadd.f32 %v280_v19, %v244_v22 }
 0x1bd   :  { %v256_v25 = vmax.f32 %v250_v21, %v254_v23  ;;  %v253_v26 = vmul.f32 0.2, %v245_v24 }
 0x1bf   :  { %258 = vst.msk [vmem:[#allocation8 + $0x8] sm:$0xff] %vm75_vm0, %v256_v25  ;;  %v255_v27 = vmax.f32 %v245_v24, %v253_v26 }
 0x1c1   :  { %257 = vst.msk [vmem:[#allocation8] sm:$0xff] %vm75_vm0, %v255_v27 }
 0x1c2   :  { %394 = shalt.err (!%p391_p5)
}
 0x1c3   :  { %270 = dma.vmem_to_hbm [thread:$0]  %s265_s11, 256, %s486_s5, [#allocation4], %s411_s23, %s411_s23, %s412_s24  }
 0x1c4   :  { %407 = dma.done.wait [#allocation4], 256  }
 0x1c5   :  { %408 = vsyncadd [#allocation4], 4294967040 }
 0x1c6   :  { %274 = vsyncpa [#allocation3], 1 }
 0x1c7   :  { %275 = vsyncpa [#allocation6], 1 }
 0x1c8   :  { %276 = vsyncpa [#allocation4], 1 }

</bundles_post_ra>
